<compile_context>
chip_gen: v6e
topology: v6e:2x2x1
jax: 0.10.0
libtpu: 0.0.40
codegen_flags: <defaults>
</compile_context>

<pallas_src>
import functools

import jax
import jax.numpy as jnp
from jax.experimental import pallas as pl
from jax.experimental.pallas import tpu as pltpu


_SUB_ROWS = 512     # in-kernel sub-chunk (bounds f32/bool intermediates)
_ROW_ALIGN = 32     # satisfies (8,128) f32/bf16 tiling and (32,128) int8 tiling


def _nll_partial_kernel(data_ref, mask_ref, out_ref, *, sub_rows):
    """One grid step: per-lane partial sums of the selected log-probs.

    data_ref: (TILE, 128) lane-dense packed log-probs, native dtype.
    mask_ref: (TILE, 128) int8 one-hot selection mask (0 for padding / non-target).
    out_ref:  (1, 1, 128) f32 per-lane partial sums for this tile.
    """
    tile = data_ref.shape[0]
    acc = jnp.zeros((1, 128), dtype=jnp.float32)
    start = 0
    while start < tile:                       # static trace-time chunking
        rows = min(sub_rows, tile - start)
        d = data_ref[pl.ds(start, rows), :].astype(jnp.float32)
        m = mask_ref[pl.ds(start, rows), :] != 0
        acc = acc + jnp.sum(jnp.where(m, d, 0.0), axis=0, keepdims=True)
        start += rows
    out_ref[...] = acc.reshape(1, 1, 128)


def _choose_tile(n_rows, tile_rows):
    """Packed-row tile: large (mem-bound), 32-aligned, and yielding >= 2 grid
    steps whenever n_rows allows (so v7x's two TensorCores both get work)."""
    if n_rows <= 2 * _ROW_ALIGN:
        return n_rows                         # single full-extent block (always legal)
    half = ((n_rows + 1) // 2 + _ROW_ALIGN - 1) // _ROW_ALIGN * _ROW_ALIGN
    tile = min(max(_ROW_ALIGN, (tile_rows // _ROW_ALIGN) * _ROW_ALIGN), half)
    if tile >= _SUB_ROWS:
        tile = (tile // _SUB_ROWS) * _SUB_ROWS
    return tile


def get_loss(pred, target, *, tile_rows=8192):
    """Equivalent of F.nll_loss(pred, target) with default 'mean' reduction.

    pred:   (N, C) log-probabilities, any float dtype (shipped in native dtype).
    target: (N,)   integer class labels.
    """
    n, c = pred.shape
    target = target.astype(jnp.int32)
    total = n * c
    n_rows = pl.cdiv(total, 128)

    tile = _choose_tile(n_rows, tile_rows)
    num_tiles = pl.cdiv(n_rows, tile)
    padded_rows = num_tiles * tile

    # Lane-dense packed view of pred (free reshape when N*C % 128 == 0).
    if total == n_rows * 128:
        data = pred.reshape(n_rows, 128)
    else:
        # TODO(synk): <128-element flat pad forces one extra XLA copy of pred.
        data = jnp.pad(pred.reshape(-1), (0, n_rows * 128 - total)).reshape(n_rows, 128)

    # int8 one-hot selection mask at the packed layout, zero-padded out to the
    # tile grid so ragged-tail garbage data rows select nothing.
    # Out-of-range targets (e.g. PyTorch's ignore_index=-100) select nothing.
    # TODO(synk): ignore_index / per-class weights are not modeled in the mean's
    # divisor (stays N); matches default nll_loss when all targets are valid.
    classes = jnp.arange(c, dtype=jnp.int32)
    valid = (target >= 0) & (target < c)
    onehot = ((target[:, None] == classes[None, :]) & valid[:, None]).astype(jnp.int8)
    mask = jnp.pad(onehot.reshape(-1),
                   (0, padded_rows * 128 - total)).reshape(padded_rows, 128)

    kernel = functools.partial(_nll_partial_kernel, sub_rows=_SUB_ROWS)

    partials = pl.pallas_call(
        kernel,
        out_shape=jax.ShapeDtypeStruct((num_tiles, 1, 128), jnp.float32),
        grid=(num_tiles,),
        in_specs=[
            pl.BlockSpec((tile, 128), lambda i: (i, 0)),
            pl.BlockSpec((tile, 128), lambda i: (i, 0)),
        ],
        out_specs=pl.BlockSpec((1, 1, 128), lambda i: (i, 0, 0)),
        compiler_params=pltpu.CompilerParams(
            dimension_semantics=("parallel",),        # megacore-shardable on v7x
            vmem_limit_bytes=32 * 1024 * 1024,
        ),
    )(data, mask)

    # Tiny JAX epilogue: lane + tile reduce, negate, divide by the true N.
    # TODO(synk): largest remaining win is fusing this selection+sum into the
    # producing log_softmax kernel to avoid the full HBM read of pred.
    total_sel = jnp.sum(partials, dtype=jnp.float32)
    return (-(total_sel / jnp.float32(n))).astype(pred.dtype)


if __name__ == "__main__":
    key = jax.random.PRNGKey(0)

    def _check(n_pts, n_cls, k, **kw):
        k1, k2 = jax.random.split(k)
        logits = jax.random.normal(k1, (n_pts, n_cls), dtype=jnp.float32)
        lp = jax.nn.log_softmax(logits, axis=-1)
        tgt = jax.random.randint(k2, (n_pts,), 0, n_cls, dtype=jnp.int32)
        loss = get_loss(lp, tgt, **kw)
        jax.block_until_ready(loss)
        ref = -jnp.mean(lp[jnp.arange(n_pts), tgt])
        assert jnp.allclose(loss, ref, atol=1e-5, rtol=1e-5), (loss, ref)

    k0, k1, k2, k3 = jax.random.split(key, 4)
    _check(8, 16, k0)                      # tiny case: single packed row
    _check(256, 40, k1)                    # C=40 (ModelNet40-like): 2 tiles, ragged data tail
    _check(50, 13, k2)                     # C=13 (S3DIS-like): flat-pad path, single block
    _check(1000, 40, k3, tile_rows=64)     # multi-tile + ragged last tile + flat pad

    print("KERNEL_OK")
</pallas_src>

<mosaic_0001>
module attributes {stable_mosaic.version = 11 : i64} {
  func.func @_nll_partial_kernel(%arg0: i32, %arg1: memref<1x128xf32, #tpu.memory_space<vmem>>, %arg2: memref<1x128xi8, #tpu.memory_space<vmem>>, %arg3: memref<1x1x128xf32, #tpu.memory_space<vmem>>) attributes {dimension_semantics = [#tpu.dimension_semantics<parallel>], iteration_bounds = array<i64: 1>, scalar_prefetch = 0 : i64, scratch_operands = 0 : i64, tpu.core_type = #tpu.core_type<tc>, window_params = [{transform_indices = @transform_0, window_bounds = array<i64: 1, 128>}, {transform_indices = @transform_1, window_bounds = array<i64: 1, 128>}, {transform_indices = @transform_2, window_bounds = array<i64: 1, 1, 128>}]} {
    %cst = arith.constant 0.000000e+00 : f32
    %0 = vector.broadcast %cst : f32 to vector<1x128xf32>
    %c0 = arith.constant 0 : index
    %c0_0 = arith.constant 0 : index
    %1 = vector.load %arg1[%c0, %c0_0] : memref<1x128xf32, #tpu.memory_space<vmem>>, vector<1x128xf32>
    %c0_1 = arith.constant 0 : index
    %c0_2 = arith.constant 0 : index
    %2 = vector.load %arg2[%c0_1, %c0_2] : memref<1x128xi8, #tpu.memory_space<vmem>>, vector<1x128xi8>
    %c0_i8 = arith.constant 0 : i8
    %3 = vector.broadcast %c0_i8 : i8 to vector<1x128xi8>
    %4 = arith.cmpi ne, %2, %3 : vector<1x128xi8>
    %cst_3 = arith.constant 0.000000e+00 : f32
    %5 = vector.broadcast %cst_3 : f32 to vector<1x128xf32>
    %6 = arith.select %4, %1, %5 : vector<1x128xi1>, vector<1x128xf32>
    %cst_4 = arith.constant dense<0.000000e+00> : vector<128xf32>
    %7 = vector.multi_reduction <add>, %6, %cst_4 [0] : vector<1x128xf32> to vector<128xf32>
    %8 = vector.shape_cast %7 : vector<128xf32> to vector<1x128xf32>
    %9 = arith.addf %0, %8 : vector<1x128xf32>
    %10 = vector.shape_cast %9 : vector<1x128xf32> to vector<1x1x128xf32>
    %c0_5 = arith.constant 0 : index
    %c0_6 = arith.constant 0 : index
    %c0_7 = arith.constant 0 : index
    %11 = vector.load %arg3[%c0_5, %c0_6, %c0_7] : memref<1x1x128xf32, #tpu.memory_space<vmem>>, vector<1x1x128xf32>
    tpu.vector_store %arg3[%c0_5, %c0_6, %c0_7], %10 {strides = array<i32>} : memref<1x1x128xf32, #tpu.memory_space<vmem>>, vector<1x1x128xf32>,
    return
  }
  func.func @transform_0(%arg0: i32) -> (i32, i32) {
    %c0_i32 = arith.constant 0 : i32
    %c0_i32_0 = arith.constant 0 : i32
    return %arg0, %c0_i32 : i32, i32
  }
  func.func @transform_1(%arg0: i32) -> (i32, i32) {
    %c0_i32 = arith.constant 0 : i32
    %c0_i32_0 = arith.constant 0 : i32
    return %arg0, %c0_i32 : i32, i32
  }
  func.func @transform_2(%arg0: i32) -> (i32, i32, i32) {
    %c0_i32 = arith.constant 0 : i32
    %c0_i32_0 = arith.constant 0 : i32
    %c0_i32_1 = arith.constant 0 : i32
    return %arg0, %c0_i32, %c0_i32_0 : i32, i32, i32
  }
}

</mosaic_0001>

<bundles_post_ra>
// kernel: tpu_custom_call.1
= control target key start
LH: loop header
LB: loop body
LE: loop exit
PB: predicated region body
PF: predicated region fallthrough
CT: control target
= control target key end

     0   :  { %7 = vsyncpa [#allocation3], 0  ;;  %s125_s0 = inlined_call_operand.hbm [shape: f32[1,128], index: 0, kind: input, shape index: {}]   ;;  %s126_s1 = inlined_call_operand.vmem [shape: s8[1,128], index: 1, kind: input, shape index: {}]   ;;  %s127_s2 = inlined_call_operand.hbm [shape: f32[1,1,128], index: 2, kind: output, shape index: {}]  }
   0x1   :  { %8 = vsyncpa [#allocation4], 0  ;;  %s98_s9 = smov [#allocation2]  }
   0x2   :  { %s15_s10 = sshll.u32 %s98_s9, 4  ;;  %s16_s10 = int_to_ptr.vmem [resolvable:$true] %s15_s10 }
   0x3   :  { %s62_s11 = scalar_lea.vmem %s16_s10, 16  ;;  %s66_s12 = scalar_lea.vmem %s16_s10, 32 }
   0x4   :  { %p63_p0 = scmp.ne.s32.totalorder %s16_s10, %s62_s11  ;;  %p67_p1 = scmp.lt.s32.totalorder %s16_s10, %s16_s10 }
   0x5   :  { %p68_p2 = scmp.lt.s32.totalorder %s66_s12, %s62_s11 }
   0x7   :  { %p69_p3 = por %p68_p2, %p67_p1 }
   0x9   :  { %p70_p4 = pnand %p69_p3, %p63_p0 }
   0xb   :  { %73 = shalt.err (!%p70_p4)
}
   0xc   :  { %18 = dma.hbm_to_vmem [thread:$0]  %s125_s0, 16, %s16_s10, [#allocation3]  }
   0xd   :  { %94 = dma.done.wait [#allocation3], 16  }
   0xe   :  { %95 = vsyncadd [#allocation3], 4294967280  ;;  %v27_v0 = vld [vmem:[%s126_s1] sm:$0x1]  ;;  %v99_v1 = vmov 0   ;;  %s100_s17 = smov [#allocation5]  }
   0xf   :  { %vm28_vm0 = vnez %v27_v0  ;;  %s42_s18 = sshll.u32 %s100_s17, 4  ;;  %v26_v3 = vld [vmem:[#allocation2] sm:$0x1]  ;;  %s43_s18 = int_to_ptr.vmem [resolvable:$true] %s42_s18 }
  0x10   :  { %v29_v2 = vsel %vm28_vm0, 16843009, %v99_v1  ;;  %s74_s19 = scalar_lea.vmem %s43_s18, 16  ;;  %s78_s0 = scalar_lea.vmem %s43_s18, 32 }
  0x11   :  { %v30_v4 = vunpack.c.0.s8 %v29_v2  ;;  %p75_p5 = scmp.ne.s32.totalorder %s43_s18, %s74_s19  ;;  %p79_p6 = scmp.lt.s32.totalorder %s43_s18, %s43_s18 }
  0x12   :  { %p80_p7 = scmp.lt.s32.totalorder %s78_s0, %s74_s19 }
  0x13   :  { %vm31_vm1 = vcmp.ne.s32.totalorder %v30_v4, 0 }
  0x14   :  { %v32_v5 = vsel %vm31_vm1, %v26_v3, 0.0  ;;  %p81_p8 = por %p80_p7, %p79_p6 }
  0x15   :  { %35 = vst [vmem:[#allocation5] sm:$0x1] %v32_v5 }
  0x16   :  { %p82_p9 = pnand %p81_p8, %p75_p5 }
  0x18   :  { %85 = shalt.err (!%p82_p9)
}
  0x19   :  { %45 = dma.vmem_to_hbm [thread:$0]  %s43_s18, 16, %s127_s2, [#allocation4]  }
  0x1a   :  { %96 = dma.done.wait [#allocation4], 16  }
  0x1b   :  { %97 = vsyncadd [#allocation4], 4294967280 }
  0x1c   :  { %49 = vsyncpa [#allocation3], 1 }
  0x1d   :  { %50 = vsyncpa [#allocation4], 1 }

</bundles_post_ra>
